<compile_context>
chip_gen: v7x
topology: tpu7x:2x2x1
jax: 0.10.0
libtpu: 0.0.40
codegen_flags: <defaults>
</compile_context>

<pallas_src>
import numpy as np
import jax
import jax.numpy as jnp
from jax.experimental import pallas as pl
from jax.experimental.pallas import tpu as pltpu

_LANE = 128
_SUBLANE = 8
_HALF_LN2 = 0.5 * float(np.log(2.0))  # hoisted constant: 2**lv -> exp


def _round_up(v, m):
    return (v + m - 1) // m * m


def _pad2d(a, rows, cols, dtype=jnp.float32):
    a = jnp.asarray(a, jnp.float32)
    r, c = a.shape
    return jnp.pad(a, ((0, rows - r), (0, cols - c))).astype(dtype)


def _sigmoid(z):
    # single-tanh form -> one EUP op per lane (vs exp + reciprocal)
    return 0.5 * jnp.tanh(0.5 * z) + 0.5


def _make_vae_kernel(d_p):
    """Kernel factory; d_p is the static lane-padded latent width."""

    def kernel(x_ref,
               w_in_ref, b_in_ref,
               w_head_ref, b_head_ref,
               w_rec_ref, b_rec_ref,
               w_out_ref, b_out_ref,
               aux_ref,
               out_ref, mu_ref, lv_ref):
        # ----- encode -----
        x = x_ref[...].astype(jnp.bfloat16)              # bf16 MXU operands
        h = _sigmoid(
            jnp.dot(x, w_in_ref[...], preferred_element_type=jnp.float32)
            + b_in_ref[...])

        # fused mean | log_var head: one wide MXU push, 128-aligned slices
        head = (jnp.dot(h.astype(jnp.bfloat16), w_head_ref[...],
                        preferred_element_type=jnp.float32)
                + b_head_ref[...])
        means = head[:, :d_p]
        log_vars = head[:, d_p:]

        # ----- decode (reparameterization) -----
        # std = sqrt(2 ** log_vars) = exp(0.5 * ln2 * log_vars)  (one EUP op)
        std = jnp.exp(_HALF_LN2 * log_vars)
        sample = means + aux_ref[...] * std              # aux (1, d_p) broadcasts

        h2 = jnp.tanh(
            jnp.dot(sample.astype(jnp.bfloat16), w_rec_ref[...],
                    preferred_element_type=jnp.float32)
            + b_rec_ref[...])
        out = _sigmoid(
            jnp.dot(h2.astype(jnp.bfloat16), w_out_ref[...],
                    preferred_element_type=jnp.float32)
            + b_out_ref[...])

        # three lane-dense, full-width (unmasked) stores
        out_ref[...] = out
        mu_ref[...] = means
        lv_ref[...] = log_vars

    return kernel


def prepare_params(params):
    """One-time padding / head fusion / bf16 cast of the weights (hoisted out
    of the per-forward path).  Weights go to bf16 (native MXU dtype on
    v5e/v6e/v7x); biases stay f32 and are added to the f32 accumulators.
    Zero padding contributes exactly 0 to every matmul."""
    D_in, H = params["w_in"].shape
    D_out = params["w_mu"].shape[1]
    h_p = _round_up(H, _LANE)
    d_p = _round_up(D_out, _LANE)
    d_in_p = _round_up(D_in, _LANE)

    return dict(
        # encoder input layer: rows kept at D_in so x needs no lane padding
        w_in=_pad2d(params["w_in"], D_in, h_p, jnp.bfloat16),
        b_in=_pad2d(params["b_in"], 1, h_p),
        # fused mu | log_var head
        w_head=jnp.concatenate(
            [_pad2d(params["w_mu"], h_p, d_p, jnp.bfloat16),
             _pad2d(params["w_lv"], h_p, d_p, jnp.bfloat16)], axis=1),
        b_head=jnp.concatenate(
            [_pad2d(params["b_mu"], 1, d_p),
             _pad2d(params["b_lv"], 1, d_p)], axis=1),
        w_rec=_pad2d(params["w_rec"], d_p, h_p, jnp.bfloat16),
        b_rec=_pad2d(params["b_rec"], 1, h_p),
        w_out=_pad2d(params["w_out"], h_p, d_in_p, jnp.bfloat16),
        b_out=_pad2d(params["b_out"], 1, d_in_p),
    )


def _pick_batch_tile(B):
    """Big batch tiles (fewer grid steps, ~0.35 us/step overhead), but keep
    >= 2 grid steps when the batch allows it so the 'parallel' axis can split
    across both v7x TensorCores."""
    if B <= 2 * _SUBLANE:
        return _round_up(B, _SUBLANE)
    half = _round_up(-(-B // 2), _SUBLANE)
    return min(1024, half)


def vae_forward(x, prepared, aux):
    """Forward pass. `prepared` comes from prepare_params(); aux is the
    (1, D_out) N(0, I) reparameterization draw shared over the batch."""
    B, D_in = x.shape
    h_p = prepared["w_in"].shape[1]
    d_p = prepared["w_rec"].shape[0]
    d_in_p = prepared["w_out"].shape[1]
    D_out = aux.shape[-1]

    tb = _pick_batch_tile(B)
    b_pad = _round_up(B, tb)
    grid = (b_pad // tb,)

    x = x.astype(jnp.float32)
    if b_pad != B:
        x = jnp.pad(x, ((0, b_pad - B), (0, 0)))   # rows only; no lane padding
    aux_p = _pad2d(jnp.asarray(aux, jnp.float32).reshape(1, D_out), 1, d_p)

    def resident(a):
        # weights / biases / noise stay VMEM-resident across all batch tiles.
        # TODO(synk): pipeline_mode=pl.Buffered(1) would drop their second
        # (unused) buffer on v7x; left at the default to stay version-safe.
        return pl.BlockSpec(a.shape, lambda i: (0, 0))

    operands = (x,
                prepared["w_in"], prepared["b_in"],
                prepared["w_head"], prepared["b_head"],
                prepared["w_rec"], prepared["b_rec"],
                prepared["w_out"], prepared["b_out"],
                aux_p)

    in_specs = ([pl.BlockSpec((tb, D_in), lambda i: (i, 0))]
                + [resident(a) for a in operands[1:]])
    out_specs = (pl.BlockSpec((tb, d_in_p), lambda i: (i, 0)),
                 pl.BlockSpec((tb, d_p), lambda i: (i, 0)),
                 pl.BlockSpec((tb, d_p), lambda i: (i, 0)))
    out_shape = (jax.ShapeDtypeStruct((b_pad, d_in_p), jnp.float32),
                 jax.ShapeDtypeStruct((b_pad, d_p), jnp.float32),
                 jax.ShapeDtypeStruct((b_pad, d_p), jnp.float32))

    # advisory cost estimate for the XLA scheduler
    flops = 2 * b_pad * (D_in * h_p + h_p * 2 * d_p + d_p * h_p + h_p * d_in_p)
    transcendentals = b_pad * (2 * h_p + d_p + d_in_p)
    weight_bytes = 2 * sum(prepared[k].size for k in ("w_in", "w_head", "w_rec", "w_out"))
    bias_bytes = 4 * sum(prepared[k].size for k in ("b_in", "b_head", "b_rec", "b_out"))
    bytes_accessed = int(4 * x.size + weight_bytes + bias_bytes + 4 * aux_p.size
                         + 4 * b_pad * (d_in_p + 2 * d_p))

    # VMEM budget: double-buffered x tile + 3 double-buffered output tiles +
    # (double-buffered) resident weights/biases, with generous headroom.
    vmem_est = (4 * 2 * tb * D_in
                + 4 * 2 * tb * (d_in_p + 2 * d_p)
                + 2 * weight_bytes + 2 * bias_bytes + 2 * 4 * aux_p.size)
    vmem_limit = int(min(max(32 << 20, 2 * vmem_est), 64 << 20))

    out_p, mu_p, lv_p = pl.pallas_call(
        _make_vae_kernel(d_p),
        out_shape=out_shape,
        grid=grid,
        in_specs=in_specs,
        out_specs=out_specs,
        compiler_params=pltpu.CompilerParams(
            dimension_semantics=("parallel",),
            vmem_limit_bytes=vmem_limit),
        cost_estimate=pl.CostEstimate(
            flops=flops,
            transcendentals=transcendentals,
            bytes_accessed=bytes_accessed),
    )(*operands)

    return out_p[:B, :D_in], mu_p[:B, :D_out], lv_p[:B, :D_out]


def init_params(key, D_in, H, D_out):
    """Deterministic init matching nn.Linear shapes (weights stored transposed)."""
    ks = jax.random.split(key, 10)

    def linear(kw, kb, fan_in, fan_out):
        bound = 1.0 / np.sqrt(fan_in)
        w = jax.random.uniform(kw, (fan_in, fan_out), jnp.float32, -bound, bound)
        b = jax.random.uniform(kb, (1, fan_out), jnp.float32, -bound, bound)
        return w, b

    w_in, b_in = linear(ks[0], ks[1], D_in, H)
    w_mu, b_mu = linear(ks[2], ks[3], H, D_out)
    w_lv, b_lv = linear(ks[4], ks[5], H, D_out)
    w_rec, b_rec = linear(ks[6], ks[7], D_out, H)
    w_out, b_out = linear(ks[8], ks[9], H, D_in)
    return dict(
        w_in=w_in, b_in=b_in,
        w_mu=w_mu, b_mu=b_mu,
        w_lv=w_lv, b_lv=b_lv,
        w_rec=w_rec, b_rec=b_rec,
        w_out=w_out, b_out=b_out,
    )


def vae_forward_ref(x, p, aux):
    """Pure-JAX f32 reference of the same forward pass (module semantics)."""
    h = jax.nn.sigmoid(x @ p["w_in"] + p["b_in"])
    means = h @ p["w_mu"] + p["b_mu"]
    log_vars = h @ p["w_lv"] + p["b_lv"]
    std = jnp.power(2.0, log_vars) ** 0.5
    sample = means + aux * std
    h2 = jnp.tanh(sample @ p["w_rec"] + p["b_rec"])
    out = jax.nn.sigmoid(h2 @ p["w_out"] + p["b_out"])
    return out, means, log_vars


if __name__ == "__main__":
    B, D_in, H, D_out = 8, 64, 32, 16

    key = jax.random.PRNGKey(0)
    k_params, k_x, k_aux = jax.random.split(key, 3)

    params = init_params(k_params, D_in, H, D_out)
    x = jax.random.normal(k_x, (B, D_in), dtype=jnp.float32)
    # torch: MultivariateNormal(zeros(D_out), eye(D_out)).sample() -> (D_out,)
    aux = jax.random.normal(k_aux, (1, D_out), dtype=jnp.float32)

    prepared = prepare_params(params)         # one-time pad / fuse / bf16 cast
    fwd = jax.jit(vae_forward)

    out, means, log_vars = fwd(x, prepared, aux)
    jax.block_until_ready((out, means, log_vars))

    out_r, means_r, log_vars_r = vae_forward_ref(x, params, aux)
    # bf16 MXU operands (f32 accumulation) -> slightly looser tolerances
    np.testing.assert_allclose(np.asarray(out), np.asarray(out_r), rtol=2e-2, atol=2e-2)
    np.testing.assert_allclose(np.asarray(means), np.asarray(means_r), rtol=2e-2, atol=2e-2)
    np.testing.assert_allclose(np.asarray(log_vars), np.asarray(log_vars_r), rtol=2e-2, atol=2e-2)

    print("KERNEL_OK")
</pallas_src>

<mosaic_0001>
module attributes {stable_mosaic.version = 11 : i64} {
  func.func @kernel(%arg0: i32, %arg1: memref<8x64xf32, #tpu.memory_space<vmem>>, %arg2: memref<64x128xbf16, #tpu.memory_space<vmem>>, %arg3: memref<1x128xf32, #tpu.memory_space<vmem>>, %arg4: memref<128x256xbf16, #tpu.memory_space<vmem>>, %arg5: memref<1x256xf32, #tpu.memory_space<vmem>>, %arg6: memref<128x128xbf16, #tpu.memory_space<vmem>>, %arg7: memref<1x128xf32, #tpu.memory_space<vmem>>, %arg8: memref<128x128xbf16, #tpu.memory_space<vmem>>, %arg9: memref<1x128xf32, #tpu.memory_space<vmem>>, %arg10: memref<1x128xf32, #tpu.memory_space<vmem>>, %arg11: memref<8x128xf32, #tpu.memory_space<vmem>>, %arg12: memref<8x128xf32, #tpu.memory_space<vmem>>, %arg13: memref<8x128xf32, #tpu.memory_space<vmem>>) attributes {dimension_semantics = [#tpu.dimension_semantics<parallel>], iteration_bounds = array<i64: 1>, scalar_prefetch = 0 : i64, scratch_operands = 0 : i64, tpu.core_type = #tpu.core_type<tc>, window_params = [{transform_indices = @transform_0, window_bounds = array<i64: 8, 64>}, {pipeline_mode = #tpu.pipeline_mode<synchronous>, transform_indices = @transform_1, window_bounds = array<i64: 64, 128>}, {pipeline_mode = #tpu.pipeline_mode<synchronous>, transform_indices = @transform_2, window_bounds = array<i64: 1, 128>}, {pipeline_mode = #tpu.pipeline_mode<synchronous>, transform_indices = @transform_3, window_bounds = array<i64: 128, 256>}, {pipeline_mode = #tpu.pipeline_mode<synchronous>, transform_indices = @transform_4, window_bounds = array<i64: 1, 256>}, {pipeline_mode = #tpu.pipeline_mode<synchronous>, transform_indices = @transform_5, window_bounds = array<i64: 128, 128>}, {pipeline_mode = #tpu.pipeline_mode<synchronous>, transform_indices = @transform_6, window_bounds = array<i64: 1, 128>}, {pipeline_mode = #tpu.pipeline_mode<synchronous>, transform_indices = @transform_7, window_bounds = array<i64: 128, 128>}, {pipeline_mode = #tpu.pipeline_mode<synchronous>, transform_indices = @transform_8, window_bounds = array<i64: 1, 128>}, {pipeline_mode = #tpu.pipeline_mode<synchronous>, transform_indices = @transform_9, window_bounds = array<i64: 1, 128>}, {transform_indices = @transform_10, window_bounds = array<i64: 8, 128>}, {transform_indices = @transform_11, window_bounds = array<i64: 8, 128>}, {transform_indices = @transform_12, window_bounds = array<i64: 8, 128>}]} {
    %c0 = arith.constant 0 : index
    %c0_0 = arith.constant 0 : index
    %0 = vector.load %arg1[%c0, %c0_0] : memref<8x64xf32, #tpu.memory_space<vmem>>, vector<8x64xf32>
    %1 = arith.truncf %0 : vector<8x64xf32> to vector<8x64xbf16>
    %c0_1 = arith.constant 0 : index
    %c0_2 = arith.constant 0 : index
    %2 = vector.load %arg2[%c0_1, %c0_2] : memref<64x128xbf16, #tpu.memory_space<vmem>>, vector<64x128xbf16>
    %cst = arith.constant dense<0.000000e+00> : vector<8x128xf32>
    %3 = tpu.matmul %1, %2, %cst {dimension_numbers = #tpu.dot_dimension_numbers<[1], [0], [0], [1], [0, 0, 1, 1], [], []>} : vector<8x64xbf16>, vector<64x128xbf16>, vector<8x128xf32> -> vector<8x128xf32>
    %c0_3 = arith.constant 0 : index
    %c0_4 = arith.constant 0 : index
    %4 = vector.load %arg3[%c0_3, %c0_4] : memref<1x128xf32, #tpu.memory_space<vmem>>, vector<1x128xf32>
    %5 = vector.broadcast %4 : vector<1x128xf32> to vector<8x128xf32>
    %6 = arith.addf %3, %5 : vector<8x128xf32>
    %cst_5 = arith.constant 5.000000e-01 : f32
    %7 = vector.broadcast %cst_5 : f32 to vector<8x128xf32>
    %8 = arith.mulf %7, %6 : vector<8x128xf32>
    %9 = math.tanh %8 : vector<8x128xf32>
    %cst_6 = arith.constant 5.000000e-01 : f32
    %10 = vector.broadcast %cst_6 : f32 to vector<8x128xf32>
    %11 = arith.mulf %10, %9 : vector<8x128xf32>
    %cst_7 = arith.constant 5.000000e-01 : f32
    %12 = vector.broadcast %cst_7 : f32 to vector<8x128xf32>
    %13 = arith.addf %11, %12 : vector<8x128xf32>
    %14 = arith.truncf %13 : vector<8x128xf32> to vector<8x128xbf16>
    %c0_8 = arith.constant 0 : index
    %c0_9 = arith.constant 0 : index
    %15 = vector.load %arg4[%c0_8, %c0_9] : memref<128x256xbf16, #tpu.memory_space<vmem>>, vector<128x256xbf16>
    %cst_10 = arith.constant dense<0.000000e+00> : vector<8x256xf32>
    %16 = tpu.matmul %14, %15, %cst_10 {dimension_numbers = #tpu.dot_dimension_numbers<[1], [0], [0], [1], [0, 0, 1, 1], [], []>} : vector<8x128xbf16>, vector<128x256xbf16>, vector<8x256xf32> -> vector<8x256xf32>
    %c0_11 = arith.constant 0 : index
    %c0_12 = arith.constant 0 : index
    %17 = vector.load %arg5[%c0_11, %c0_12] : memref<1x256xf32, #tpu.memory_space<vmem>>, vector<1x256xf32>
    %18 = vector.broadcast %17 : vector<1x256xf32> to vector<8x256xf32>
    %19 = arith.addf %16, %18 : vector<8x256xf32>
    %20 = vector.extract_strided_slice %19 {offsets = [0, 0], sizes = [8, 128], strides = [1, 1]} : vector<8x256xf32> to vector<8x128xf32>
    %21 = vector.extract_strided_slice %19 {offsets = [0, 128], sizes = [8, 128], strides = [1, 1]} : vector<8x256xf32> to vector<8x128xf32>
    %cst_13 = arith.constant 0.346573591 : f32
    %22 = vector.broadcast %cst_13 : f32 to vector<8x128xf32>
    %23 = arith.mulf %22, %21 : vector<8x128xf32>
    %24 = math.exp %23 : vector<8x128xf32>
    %c0_14 = arith.constant 0 : index
    %c0_15 = arith.constant 0 : index
    %25 = vector.load %arg10[%c0_14, %c0_15] : memref<1x128xf32, #tpu.memory_space<vmem>>, vector<1x128xf32>
    %26 = vector.broadcast %25 : vector<1x128xf32> to vector<8x128xf32>
    %27 = arith.mulf %26, %24 : vector<8x128xf32>
    %28 = arith.addf %20, %27 : vector<8x128xf32>
    %29 = arith.truncf %28 : vector<8x128xf32> to vector<8x128xbf16>
    %c0_16 = arith.constant 0 : index
    %c0_17 = arith.constant 0 : index
    %30 = vector.load %arg6[%c0_16, %c0_17] : memref<128x128xbf16, #tpu.memory_space<vmem>>, vector<128x128xbf16>
    %cst_18 = arith.constant dense<0.000000e+00> : vector<8x128xf32>
    %31 = tpu.matmul %29, %30, %cst_18 {dimension_numbers = #tpu.dot_dimension_numbers<[1], [0], [0], [1], [0, 0, 1, 1], [], []>} : vector<8x128xbf16>, vector<128x128xbf16>, vector<8x128xf32> -> vector<8x128xf32>
    %c0_19 = arith.constant 0 : index
    %c0_20 = arith.constant 0 : index
    %32 = vector.load %arg7[%c0_19, %c0_20] : memref<1x128xf32, #tpu.memory_space<vmem>>, vector<1x128xf32>
    %33 = vector.broadcast %32 : vector<1x128xf32> to vector<8x128xf32>
    %34 = arith.addf %31, %33 : vector<8x128xf32>
    %35 = math.tanh %34 : vector<8x128xf32>
    %36 = arith.truncf %35 : vector<8x128xf32> to vector<8x128xbf16>
    %c0_21 = arith.constant 0 : index
    %c0_22 = arith.constant 0 : index
    %37 = vector.load %arg8[%c0_21, %c0_22] : memref<128x128xbf16, #tpu.memory_space<vmem>>, vector<128x128xbf16>
    %cst_23 = arith.constant dense<0.000000e+00> : vector<8x128xf32>
    %38 = tpu.matmul %36, %37, %cst_23 {dimension_numbers = #tpu.dot_dimension_numbers<[1], [0], [0], [1], [0, 0, 1, 1], [], []>} : vector<8x128xbf16>, vector<128x128xbf16>, vector<8x128xf32> -> vector<8x128xf32>
    %c0_24 = arith.constant 0 : index
    %c0_25 = arith.constant 0 : index
    %39 = vector.load %arg9[%c0_24, %c0_25] : memref<1x128xf32, #tpu.memory_space<vmem>>, vector<1x128xf32>
    %40 = vector.broadcast %39 : vector<1x128xf32> to vector<8x128xf32>
    %41 = arith.addf %38, %40 : vector<8x128xf32>
    %cst_26 = arith.constant 5.000000e-01 : f32
    %42 = vector.broadcast %cst_26 : f32 to vector<8x128xf32>
    %43 = arith.mulf %42, %41 : vector<8x128xf32>
    %44 = math.tanh %43 : vector<8x128xf32>
    %cst_27 = arith.constant 5.000000e-01 : f32
    %45 = vector.broadcast %cst_27 : f32 to vector<8x128xf32>
    %46 = arith.mulf %45, %44 : vector<8x128xf32>
    %cst_28 = arith.constant 5.000000e-01 : f32
    %47 = vector.broadcast %cst_28 : f32 to vector<8x128xf32>
    %48 = arith.addf %46, %47 : vector<8x128xf32>
    %c0_29 = arith.constant 0 : index
    %c0_30 = arith.constant 0 : index
    %49 = vector.load %arg11[%c0_29, %c0_30] : memref<8x128xf32, #tpu.memory_space<vmem>>, vector<8x128xf32>
    tpu.vector_store %arg11[%c0_29, %c0_30], %48 {strides = array<i32>} : memref<8x128xf32, #tpu.memory_space<vmem>>, vector<8x128xf32>,
    %c0_31 = arith.constant 0 : index
    %c0_32 = arith.constant 0 : index
    %50 = vector.load %arg12[%c0_31, %c0_32] : memref<8x128xf32, #tpu.memory_space<vmem>>, vector<8x128xf32>
    tpu.vector_store %arg12[%c0_31, %c0_32], %20 {strides = array<i32>} : memref<8x128xf32, #tpu.memory_space<vmem>>, vector<8x128xf32>,
    %c0_33 = arith.constant 0 : index
    %c0_34 = arith.constant 0 : index
    %51 = vector.load %arg13[%c0_33, %c0_34] : memref<8x128xf32, #tpu.memory_space<vmem>>, vector<8x128xf32>
    tpu.vector_store %arg13[%c0_33, %c0_34], %21 {strides = array<i32>} : memref<8x128xf32, #tpu.memory_space<vmem>>, vector<8x128xf32>,
    return
  }
  func.func @transform_0(%arg0: i32) -> (i32, i32) {
    %c0_i32 = arith.constant 0 : i32
    %c0_i32_0 = arith.constant 0 : i32
    return %arg0, %c0_i32 : i32, i32
  }
  func.func @transform_1(%arg0: i32) -> (i32, i32) {
    %c0_i32 = arith.constant 0 : i32
    %c0_i32_0 = arith.constant 0 : i32
    %c0_i32_1 = arith.constant 0 : i32
    return %c0_i32, %c0_i32_0 : i32, i32
  }
  func.func @transform_2(%arg0: i32) -> (i32, i32) {
    %c0_i32 = arith.constant 0 : i32
    %c0_i32_0 = arith.constant 0 : i32
    %c0_i32_1 = arith.constant 0 : i32
    return %c0_i32, %c0_i32_0 : i32, i32
  }
  func.func @transform_3(%arg0: i32) -> (i32, i32) {
    %c0_i32 = arith.constant 0 : i32
    %c0_i32_0 = arith.constant 0 : i32
    %c0_i32_1 = arith.constant 0 : i32
    return %c0_i32, %c0_i32_0 : i32, i32
  }
  func.func @transform_4(%arg0: i32) -> (i32, i32) {
    %c0_i32 = arith.constant 0 : i32
    %c0_i32_0 = arith.constant 0 : i32
    %c0_i32_1 = arith.constant 0 : i32
    return %c0_i32, %c0_i32_0 : i32, i32
  }
  func.func @transform_5(%arg0: i32) -> (i32, i32) {
    %c0_i32 = arith.constant 0 : i32
    %c0_i32_0 = arith.constant 0 : i32
    %c0_i32_1 = arith.constant 0 : i32
    return %c0_i32, %c0_i32_0 : i32, i32
  }
  func.func @transform_6(%arg0: i32) -> (i32, i32) {
    %c0_i32 = arith.constant 0 : i32
    %c0_i32_0 = arith.constant 0 : i32
    %c0_i32_1 = arith.constant 0 : i32
    return %c0_i32, %c0_i32_0 : i32, i32
  }
  func.func @transform_7(%arg0: i32) -> (i32, i32) {
    %c0_i32 = arith.constant 0 : i32
    %c0_i32_0 = arith.constant 0 : i32
    %c0_i32_1 = arith.constant 0 : i32
    return %c0_i32, %c0_i32_0 : i32, i32
  }
  func.func @transform_8(%arg0: i32) -> (i32, i32) {
    %c0_i32 = arith.constant 0 : i32
    %c0_i32_0 = arith.constant 0 : i32
    %c0_i32_1 = arith.constant 0 : i32
    return %c0_i32, %c0_i32_0 : i32, i32
  }
  func.func @transform_9(%arg0: i32) -> (i32, i32) {
    %c0_i32 = arith.constant 0 : i32
    %c0_i32_0 = arith.constant 0 : i32
    %c0_i32_1 = arith.constant 0 : i32
    return %c0_i32, %c0_i32_0 : i32, i32
  }
  func.func @transform_10(%arg0: i32) -> (i32, i32) {
    %c0_i32 = arith.constant 0 : i32
    %c0_i32_0 = arith.constant 0 : i32
    return %arg0, %c0_i32 : i32, i32
  }
  func.func @transform_11(%arg0: i32) -> (i32, i32) {
    %c0_i32 = arith.constant 0 : i32
    %c0_i32_0 = arith.constant 0 : i32
    return %arg0, %c0_i32 : i32, i32
  }
  func.func @transform_12(%arg0: i32) -> (i32, i32) {
    %c0_i32 = arith.constant 0 : i32
    %c0_i32_0 = arith.constant 0 : i32
    return %arg0, %c0_i32 : i32, i32
  }
}

</mosaic_0001>

<bundles_post_ra>
// kernel: vae_forward.1
= control target key start
LH: loop header
LB: loop body
LE: loop exit
PB: predicated region body
PF: predicated region fallthrough
CT: control target
= control target key end

     0   :  { %18 = vsyncpa [#allocation3], 0  ;;  %s1229_s0 = inlined_call_operand.hbm [shape: f32[8,64], index: 0, kind: input, shape index: {}]   ;;  %s1230_s1 = inlined_call_operand.hbm [shape: bf16[64,128], index: 1, kind: input, shape index: {}]   ;;  %s1231_s2 = inlined_call_operand.vmem [shape: f32[1,128], index: 2, kind: input, shape index: {}]   ;;  %s1232_s3 = inlined_call_operand.hbm [shape: bf16[128,256], index: 3, kind: input, shape index: {}]   ;;  %s1233_s4 = inlined_call_operand.vmem [shape: f32[1,256], index: 4, kind: input, shape index: {}]   ;;  %s1234_s5 = inlined_call_operand.hbm [shape: bf16[128,128], index: 5, kind: input, shape index: {}]   ;;  %s1235_s6 = inlined_call_operand.vmem [shape: f32[1,128], index: 6, kind: input, shape index: {}]   ;;  %s1236_s7 = inlined_call_operand.hbm [shape: bf16[128,128], index: 7, kind: input, shape index: {}]   ;;  %s1237_s8 = inlined_call_operand.vmem [shape: f32[1,128], index: 8, kind: input, shape index: {}]   ;;  %s1238_s9 = inlined_call_operand.vmem [shape: f32[1,128], index: 9, kind: input, shape index: {}]   ;;  %s1239_s10 = inlined_call_operand.hbm [shape: f32[8,128], index: 10, kind: output, shape index: {0}]   ;;  %s1240_s11 = inlined_call_operand.hbm [shape: f32[8,128], index: 11, kind: output, shape index: {1}]   ;;  %s1241_s12 = inlined_call_operand.hbm [shape: f32[8,128], index: 12, kind: output, shape index: {2}]  }
   0x1   :  { %19 = vsyncpa [#allocation6], 0 }
   0x2   :  { %20 = vsyncpa [#allocation9], 0 }
   0x3   :  { %21 = vsyncpa [#allocation4], 0 }
   0x4   :  { %22 = vsyncpa [#allocation13], 0  ;;  %s1003_s21 = smov [#allocation5]   ;;  %s817_s25 = scalar_lea.hbm %s1230_s1, 512 }
   0x5   :  { %s38_s22 = sshll.u32 %s1003_s21, 4  ;;  %p818_p0 = scmp.ne.s32.totalorder %s1230_s1, %s817_s25  ;;  %s39_s22 = int_to_ptr.vmem [resolvable:$true] %s38_s22 }
   0x6   :  { %p821_p1 = scmp.lt.u32.totalorder %s817_s25, %s1230_s1 }
   0x8   :  { %p823_p2 = pnand %p821_p1, %p818_p0 }
   0xa   :  { %826 = shalt.err (!%p823_p2)
}
   0xb   :  { %s827_s30 = scalar_lea.vmem %s39_s22, 512  ;;  %p832_p4 = scmp.lt.s32.totalorder %s39_s22, %s39_s22 }
   0xc   :  { %p828_p3 = scmp.ne.s32.totalorder %s39_s22, %s827_s30  ;;  %p833_p5 = scmp.lt.s32.totalorder %s827_s30, %s827_s30 }
   0xe   :  { %p834_p6 = por %p833_p5, %p832_p4 }
  0x10   :  { %p835_p7 = pnand %p834_p6, %p828_p3 }
  0x12   :  { %838 = shalt.err (!%p835_p7)
}
  0x13   :  { %s1004_s13 = smov 64   ;;  %s1005_s14 = smov 4  }
  0x14   :  { %44 = dma.hbm_to_vmem [thread:$0]  %s1230_s1, 512, %s39_s22, [#allocation6], %s1004_s13, %s1004_s13, %s1005_s14  }
  0x15   :  { %s1006_s17 = smov [#allocation8]   ;;  %s1007_s19 = smov [#allocation2]  }
  0x16   :  { %s66_s18 = sshll.u32 %s1006_s17, 4  ;;  %s29_s20 = sshll.u32 %s1007_s19, 4  ;;  %s67_s18 = int_to_ptr.vmem [resolvable:$true] %s66_s18  ;;  %s30_s20 = int_to_ptr.vmem [resolvable:$true] %s29_s20 }
  0x17   :  { %s839_s24 = scalar_lea.hbm %s1234_s5, 1024 }
  0x18   :  { %p840_p8 = scmp.ne.s32.totalorder %s1234_s5, %s839_s24  ;;  %p843_p9 = scmp.lt.u32.totalorder %s839_s24, %s1234_s5 }
  0x1a   :  { %p845_p10 = pnand %p843_p9, %p840_p8 }
  0x1c   :  { %848 = shalt.err (!%p845_p10)
}
  0x1d   :  { %s849_s1 = scalar_lea.vmem %s67_s18, 1024  ;;  %p854_p12 = scmp.lt.s32.totalorder %s67_s18, %s67_s18 }
  0x1e   :  { %p850_p11 = scmp.ne.s32.totalorder %s67_s18, %s849_s1  ;;  %p855_p13 = scmp.lt.s32.totalorder %s849_s1, %s849_s1 }
  0x20   :  { %p856_p0 = por %p855_p13, %p854_p12 }
  0x22   :  { %p857_p1 = pnand %p856_p0, %p850_p11 }
  0x24   :  { %860 = shalt.err (!%p857_p1)
}
  0x25   :  { %72 = dma.hbm_to_vmem [thread:$0]  %s1234_s5, 1024, %s67_s18, [#allocation9], %s1004_s13, %s1004_s13, %s1005_s14  }
  0x26   :  { %s861_s16 = scalar_lea.hbm %s1229_s0, 128 }
  0x27   :  { %p862_p2 = scmp.ne.s32.totalorder %s1229_s0, %s861_s16  ;;  %p865_p3 = scmp.lt.u32.totalorder %s861_s16, %s1229_s0 }
  0x29   :  { %p867_p4 = pnand %p865_p3, %p862_p2 }
  0x2b   :  { %870 = shalt.err (!%p867_p4)
}
  0x2c   :  { %s871_s24 = scalar_lea.vmem %s30_s20, 128  ;;  %p876_p6 = scmp.lt.s32.totalorder %s30_s20, %s30_s20 }
  0x2d   :  { %p872_p5 = scmp.ne.s32.totalorder %s30_s20, %s871_s24  ;;  %p877_p7 = scmp.lt.s32.totalorder %s871_s24, %s871_s24 }
  0x2f   :  { %p878_p8 = por %p877_p7, %p876_p6 }
  0x31   :  { %p879_p9 = pnand %p878_p8, %p872_p5 }
  0x33   :  { %882 = shalt.err (!%p879_p9)
}
  0x34   :  { %32 = dma.hbm_to_vmem [thread:$0]  %s1229_s0, 128, %s30_s20, [#allocation3]  }
  0x35   :  { %s1008_s25 = smov [#allocation7]   ;;  %s883_s1 = scalar_lea.hbm %s1232_s3, 2048 }
  0x36   :  { %s52_s26 = sshll.u32 %s1008_s25, 4  ;;  %p884_p10 = scmp.ne.s32.totalorder %s1232_s3, %s883_s1  ;;  %s53_s26 = int_to_ptr.vmem [resolvable:$true] %s52_s26 }
  0x37   :  { %p887_p11 = scmp.lt.u32.totalorder %s883_s1, %s1232_s3 }
  0x39   :  { %p889_p12 = pnand %p887_p11, %p884_p10 }
  0x3b   :  { %892 = shalt.err (!%p889_p12)
}
  0x3c   :  { %s893_s16 = scalar_lea.vmem %s53_s26, 2048  ;;  %p898_p0 = scmp.lt.s32.totalorder %s53_s26, %s53_s26 }
  0x3d   :  { %p894_p13 = scmp.ne.s32.totalorder %s53_s26, %s893_s16  ;;  %p899_p1 = scmp.lt.s32.totalorder %s893_s16, %s893_s16 }
  0x3f   :  { %p900_p2 = por %p899_p1, %p898_p0 }
  0x41   :  { %p901_p3 = pnand %p900_p2, %p894_p13 }
  0x43   :  { %904 = shalt.err (!%p901_p3)
}
  0x44   :  { %s1009_s0 = smov 128   ;;  %s1010_s20 = smov 8  }
  0x45   :  { %58 = dma.hbm_to_vmem [thread:$0]  %s1232_s3, 2048, %s53_s26, [#allocation6], %s1009_s0, %s1009_s0, %s1010_s20  }
  0x46   :  { %s1011_s21 = smov [#allocation10]   ;;  %s905_s18 = scalar_lea.hbm %s1236_s7, 1024 }
  0x47   :  { %s80_s23 = sshll.u32 %s1011_s21, 4  ;;  %p906_p4 = scmp.ne.s32.totalorder %s1236_s7, %s905_s18  ;;  %s81_s23 = int_to_ptr.vmem [resolvable:$true] %s80_s23 }
  0x48   :  { %p909_p5 = scmp.lt.u32.totalorder %s905_s18, %s1236_s7 }
  0x4a   :  { %p911_p6 = pnand %p909_p5, %p906_p4 }
  0x4c   :  { %914 = shalt.err (!%p911_p6)
}
  0x4d   :  { %s915_s22 = scalar_lea.vmem %s81_s23, 1024  ;;  %p920_p8 = scmp.lt.s32.totalorder %s81_s23, %s81_s23 }
  0x4e   :  { %p916_p7 = scmp.ne.s32.totalorder %s81_s23, %s915_s22  ;;  %p921_p9 = scmp.lt.s32.totalorder %s915_s22, %s915_s22 }
  0x50   :  { %p922_p10 = por %p921_p9, %p920_p8 }
  0x52   :  { %p923_p11 = pnand %p922_p10, %p916_p7 }
  0x54   :  { %926 = shalt.err (!%p923_p11)
}
  0x55   :  { %86 = dma.hbm_to_vmem [thread:$0]  %s1236_s7, 1024, %s81_s23, [#allocation9], %s1004_s13, %s1004_s13, %s1005_s14  }
  0x56   :  { %993 = dma.done.wait [#allocation3], 128  }
  0x57   :  { %994 = vsyncadd [#allocation3], 4294967168 }
  0x58   :  { %995 = dma.done.wait [#allocation6], 2560  }
  0x59   :  { %996 = vsyncadd [#allocation6], 4294964736 }
  0x5a   :  { %997 = dma.done.wait [#allocation9], 2048  }
  0x5b   :  { %998 = vsyncadd [#allocation9], 4294965248  ;;  %v1012_v0 = vmov 0.0   ;;  %vm1013_vm0 = vmmov 0   ;;  %v765_v1 = vld [vmem:[#allocation5] sm:$0xff]   ;;  %v766_v2 = vld [vmem:[#allocation5 + $0x8] sm:$0xff]   ;;  %v215_v47 = vlaneseq }
  0x5c   :  { %698 = vmatprep.subr.bf16.mxu0 %v1012_v0  ;;  %706 = vmatprep.mubr.msk.bf16.mxu0 %vm1013_vm0, %v1012_v0  ;;  %v769_v3 = vld [vmem:[#allocation7 + $0x4] ss:$8 sps:$4 sm:$0xff]   ;;  %v771_v4 = vld [vmem:[#allocation7] ss:$8 sps:$4 sm:$0xff]   ;;  %v767_v5 = vld [vmem:[#allocation5 + $0x10] sm:$0xff]   ;;  %vm148_vm1 = vcmask 523264  }
  0x5d   :  { %699 = vmatpush3.bf16.msra.mxu0 %v765_v1  ;;  %v772_v6 = vld [vmem:[#allocation7 + $0x14] ss:$8 sps:$4 sm:$0xff]   ;;  %305 = vmatprep.subr.bf16.mxu1 %v769_v3  ;;  %v774_v9 = vld [vmem:[#allocation7 + $0x10] ss:$8 sps:$4 sm:$0xff]   ;;  %v775_v10 = vld [vmem:[#allocation7 + $0x24] ss:$8 sps:$4 sm:$0xff]  }
  0x5e   :  { %700 = vmatprep.subr.bf16.mxu0 %v1012_v0  ;;  %v768_v7 = vld [vmem:[#allocation5 + $0x18] sm:$0xff]   ;;  %306 = vmatpush1.bf16.msra.mxu1 %v771_v4  ;;  %v777_v11 = vld [vmem:[#allocation7 + $0x20] ss:$8 sps:$4 sm:$0xff]   ;;  %v781_v15 = vld [vmem:[#allocation7 + $0x44] ss:$8 sps:$4 sm:$0xff]   ;;  %v1014_v23 = vmov 0  }
  0x5f   :  { %v107_v8 = vld [vmem:[#allocation2] sm:$0xff]  ;;  %307 = vmatprep.subr.bf16.mxu1 %v772_v6  ;;  %v783_v16 = vld [vmem:[#allocation7 + $0x40] ss:$8 sps:$4 sm:$0xff]   ;;  %v787_v19 = vld [vmem:[#allocation7 + $0x64] ss:$8 sps:$4 sm:$0xff]   ;;  %337 = vmatprep.mubr.bf16.mxu1 %v1014_v23  ;;  %v216_v48 = vshrl.u32 %v215_v47, 7 }
  0x60   :  { %v108_v12 = vpack.c.bf16 %v107_v8, %v107_v8  ;;  %v778_v13 = vld [vmem:[#allocation7 + $0x34] ss:$8 sps:$4 sm:$0xff]   ;;  %v780_v14 = vld [vmem:[#allocation7 + $0x30] ss:$8 sps:$4 sm:$0xff]   ;;  %v789_v20 = vld [vmem:[#allocation7 + $0x60] ss:$8 sps:$4 sm:$0xff]  }
  0x61   :  { %701 = vmatpush3.bf16.msra.mxu0 %v766_v2  ;;  %v784_v17 = vld [vmem:[#allocation7 + $0x54] ss:$8 sps:$4 sm:$0xff]   ;;  %v786_v18 = vld [vmem:[#allocation7 + $0x50] ss:$8 sps:$4 sm:$0xff]   ;;  %v793_v24 = vld [vmem:[#allocation8] sm:$0xff]   ;;  %v217_v49 = vsub.s32 0, %v216_v48 }
  0x62   :  { %702 = vmatprep.subr.bf16.mxu0 %v1012_v0  ;;  %308 = vmatpush1.bf16.msra.mxu1 %v774_v9  ;;  %v790_v21 = vld [vmem:[#allocation7 + $0x74] ss:$8 sps:$4 sm:$0xff]   ;;  %v792_v22 = vld [vmem:[#allocation7 + $0x70] ss:$8 sps:$4 sm:$0xff]   ;;  %v794_v25 = vld [vmem:[#allocation8 + $0x8] sm:$0xff]   ;;  %v221_v51 = vsub.s32 1, %v216_v48 }
  0x63   :  { %309 = vmatprep.subr.bf16.mxu1 %v775_v10  ;;  %v634_v26 = vld [vmem:[%s1231_s2] ss:$0 sm:$0xff]  ;;  %v795_v37 = vld [vmem:[#allocation8 + $0x10] sm:$0xff]   ;;  %v797_v39 = vld [vmem:[#allocation8 + $0x20] sm:$0xff]   ;;  %s1015_s15 = smov [#allocation12]  }
  0x64   :  { %v796_v38 = vld [vmem:[#allocation8 + $0x18] sm:$0xff]   ;;  %v798_v40 = vld [vmem:[#allocation8 + $0x28] sm:$0xff]   ;;  %v799_v41 = vld [vmem:[#allocation8 + $0x30] sm:$0xff]   ;;  %s606_s16 = sshll.u32 %s1015_s15, 4  ;;  %s607_s16 = int_to_ptr.vmem [resolvable:$true] %s606_s16 }
  0x65   :  { %703 = vmatpush3.bf16.msra.mxu0 %v767_v5  ;;  %v800_v42 = vld [vmem:[#allocation8 + $0x38] sm:$0xff]   ;;  %v801_v43 = vld [vmem:[#allocation10] sm:$0xff]   ;;  %v802_v44 = vld [vmem:[#allocation10 + $0x8] sm:$0xff]   ;;  %s927_s0 = scalar_lea.vmem %s607_s16, 128  ;;  %p932_p13 = scmp.lt.s32.totalorder %s607_s16, %s607_s16 }
  0x66   :  { %704 = vmatprep.subr.bf16.mxu0 %v1012_v0  ;;  %310 = vmatpush1.bf16.msra.mxu1 %v777_v11  ;;  %v803_v45 = vld [vmem:[#allocation10 + $0x10] sm:$0xff]   ;;  %v804_v46 = vld [vmem:[#allocation10 + $0x18] sm:$0xff]   ;;  %v805_v4 = vld [vmem:[#allocation10 + $0x20] sm:$0xff]   ;;  %p928_p12 = scmp.ne.s32.totalorder %s607_s16, %s927_s0  ;;  %p933_p0 = scmp.lt.s32.totalorder %s927_s0, %s927_s0 }
  0x67   :  { %311 = vmatprep.subr.bf16.mxu1 %v778_v13  ;;  %v213_v50 = vld [vmem:[%s1233_s4] sm:$0x3]  ;;  %v806_v5 = vld [vmem:[#allocation10 + $0x28] sm:$0xff]   ;;  %v807_v6 = vld [vmem:[#allocation10 + $0x30] sm:$0xff]  }
  0x68   :  { %v218_v52 = vrot.slane %v213_v50, %v217_v49  ;;  %v222_v53 = vrot.slane %v213_v50, %v221_v51  ;;  %v656_v62 = vld [vmem:[%s1238_s9] ss:$0 sm:$0xff]  ;;  %p934_p1 = por %p933_p0, %p932_p13 }
  0x69   :  { %705 = vmatpush3.bf16.msra.mxu0 %v768_v7  ;;  %v808_v7 = vld [vmem:[#allocation10 + $0x38] sm:$0xff]  }
  0x6a   :  { %710 = vmatprep.subr.bf16.mxu0 %v1012_v0  ;;  %312 = vmatpush1.bf16.msra.mxu1 %v780_v14  ;;  %v657_v8 = vld [vmem:[%s1235_s6] ss:$0 sm:$0xff]  ;;  %p935_p2 = pnand %p934_p1, %p928_p12 }
  0x6b   :  { %313 = vmatprep.subr.bf16.mxu1 %v781_v15 }
  0x6c   :  { %707 = vmatmul.mubr.msk.bf16.vlgmr.msra.gmra.mrb[0].mxu0 %vm148_vm1, %v108_v12 }
  0x6d   :  { %726 = vmatprep.mubr.msk.bf16.mxu0 %vm1013_vm0, %v1012_v0  ;;  %711 = vmatpush3.bf16.msra.mxu0 %v793_v24 }
  0x6e   :  { %314 = vmatpush1.bf16.msra.mxu1 %v783_v16  ;;  %712 = vmatprep.subr.bf16.mxu0 %v1012_v0 }
  0x6f   :  { %315 = vmatprep.subr.bf16.mxu1 %v784_v17 }
  0x71   :  { %713 = vmatpush3.bf16.msra.mxu0 %v794_v25 }
  0x72   :  { %316 = vmatpush1.bf16.msra.mxu1 %v786_v18  ;;  %714 = vmatprep.subr.bf16.mxu0 %v1012_v0 }
  0x73   :  { %317 = vmatprep.subr.bf16.mxu1 %v787_v19 }
  0x75   :  { %715 = vmatpush3.bf16.msra.mxu0 %v795_v37 }
  0x76   :  { %318 = vmatpush1.bf16.msra.mxu1 %v789_v20  ;;  %716 = vmatprep.subr.bf16.mxu0 %v1012_v0 }
  0x77   :  { %319 = vmatprep.subr.bf16.mxu1 %v790_v21 }
  0x79   :  { %717 = vmatpush3.bf16.msra.mxu0 %v796_v38 }
  0x7a   :  { %320 = vmatpush1.bf16.msra.mxu1 %v792_v22  ;;  %718 = vmatprep.subr.bf16.mxu0 %v1012_v0 }
  0x7b   :  { %730 = vmatprep.subr.bf16.mxu1 %v1012_v0 }
  0x7d   :  { %719 = vmatpush3.bf16.msra.mxu0 %v797_v39 }
  0x7e   :  { %720 = vmatprep.subr.bf16.mxu0 %v1012_v0 }
  0x81   :  { %721 = vmatpush3.bf16.msra.mxu0 %v798_v40 }
  0x82   :  { %722 = vmatprep.subr.bf16.mxu0 %v1012_v0 }
  0x85   :  { %723 = vmatpush3.bf16.msra.mxu0 %v799_v41 }
  0x86   :  { %724 = vmatprep.subr.bf16.mxu0 %v1012_v0 }
  0x89   :  { %725 = vmatpush3.bf16.msra.mxu0 %v800_v42 }
 0x13f   :  { %v186_v27 = vpop.f32.mrb[0].mxu0 }
 0x140   :  { %v187_v28 = vadd.f32 %v634_v26, %v186_v27  ;;  %v708_v29 = vpop.f32.mrb[1].mxu0 }
 0x141   :  { %v189_v30 = vpop.f32.mrb[2].mxu0 }
 0x142   :  { %v192_v31 = vmul.f32 0.5, %v187_v28  ;;  %v709_v32 = vpop.f32.mrb[3].mxu0 }
 0x144   :  { %809 = vtanh.f32 %v192_v31 }
 0x14e   :  { %v810_v33 = vpop.eup %809 }
 0x14f   :  { %v194_v34 = vmul.f32 0.5, %v810_v33 }
 0x151   :  { %v195_v35 = vadd.f32 0.5, %v194_v34 }
 0x153   :  { %v196_v36 = vpack.c.bf16 %v195_v35, %v195_v35 }
 0x155   :  { %338 = vmatmul.mubr.bf16.vlgmr.msra.gmra.mrb[0].mxu1 %v196_v36 }
 0x156   :  { %746 = vmatprep.mubr.msk.bf16.mxu1 %vm1013_vm0, %v1012_v0  ;;  %731 = vmatpush3.bf16.msra.mxu1 %v801_v43 }
 0x157   :  { %732 = vmatprep.subr.bf16.mxu1 %v1012_v0 }
 0x15a   :  { %733 = vmatpush3.bf16.msra.mxu1 %v802_v44 }
 0x15b   :  { %734 = vmatprep.subr.bf16.mxu1 %v1012_v0 }
 0x15e   :  { %735 = vmatpush3.bf16.msra.mxu1 %v803_v45 }
 0x15f   :  { %736 = vmatprep.subr.bf16.mxu1 %v1012_v0 }
 0x162   :  { %737 = vmatpush3.bf16.msra.mxu1 %v804_v46 }
 0x163   :  { %738 = vmatprep.subr.bf16.mxu1 %v1012_v0 }
 0x166   :  { %739 = vmatpush3.bf16.msra.mxu1 %v805_v4 }
 0x167   :  { %740 = vmatprep.subr.bf16.mxu1 %v1012_v0 }
 0x16a   :  { %741 = vmatpush3.bf16.msra.mxu1 %v806_v5 }
 0x16b   :  { %742 = vmatprep.subr.bf16.mxu1 %v1012_v0 }
 0x16e   :  { %743 = vmatpush3.bf16.msra.mxu1 %v807_v6 }
 0x16f   :  { %744 = vmatprep.subr.bf16.mxu1 %v1012_v0 }
 0x172   :  { %745 = vmatpush3.bf16.msra.mxu1 %v808_v7 }
 0x228   :  { %v339_v54 = vpop.f32.mrb[0].mxu1 }
 0x229   :  { %v340_v55 = vadd.f32 %v339_v54, %v218_v52  ;;  %v341_v56 = vpop.f32.mrb[1].mxu1 }
 0x22a   :  { %v342_v57 = vadd.f32 %v341_v56, %v222_v53  ;;  %v343_v58 = vpop.f32.mrb[2].mxu1 }
 0x22b   :  { %588 = vst [vmem:[#allocation12] sm:$0xff] %v340_v55  ;;  %v344_v59 = vpop.f32.mrb[3].mxu1 }
 0x22c   :  { %v346_v60 = vmul.f32 0.3465736, %v342_v57  ;;  %589 = vst [vmem:[#allocation14] sm:$0xff] %v342_v57 }
 0x22e   :  { %v347_v61 = vmul.f32 1.442695, %v346_v60 }
 0x230   :  { %811 = vpow2.f32 %v347_v61 }
 0x23a   :  { %v812_v63 = vpop.eup %811 }
 0x23b   :  { %v356_v1 = vmul.f32 %v812_v63, %v656_v62 }
 0x23d   :  { %v357_v2 = vadd.f32 %v356_v1, %v340_v55 }
 0x23f   :  { %v358_v3 = vpack.c.bf16 %v357_v2, %v357_v2 }
 0x241   :  { %727 = vmatmul.mubr.bf16.vlgmr.msra.gmra.mrb[4].mxu0 %v358_v3 }
 0x314   :  { %v464_v9 = vpop.f32.mrb[4].mxu0 }
 0x315   :  { %v465_v10 = vadd.f32 %v657_v8, %v464_v9  ;;  %v728_v11 = vpop.f32.mrb[5].mxu0 }
 0x316   :  { %v467_v12 = vpop.f32.mrb[6].mxu0 }
 0x317   :  { %813 = vtanh.f32 %v465_v10  ;;  %v729_v13 = vpop.f32.mrb[7].mxu0 }
 0x321   :  { %v814_v14 = vpop.eup %813 }
 0x322   :  { %v471_v15 = vpack.c.bf16 %v814_v14, %v814_v14 }
 0x324   :  { %747 = vmatmul.mubr.bf16.vlgmr.msra.gmra.mrb[4].mxu1 %v471_v15 }
 0x325   :  { %938 = shalt.err (!%p935_p2)
}
 0x326   :  { %s939_s17 = scalar_lea.hbm %s1240_s11, 128 }
 0x327   :  { %p940_p3 = scmp.ne.s32.totalorder %s1240_s11, %s939_s17  ;;  %p943_p4 = scmp.lt.u32.totalorder %s939_s17, %s1240_s11 }
 0x329   :  { %p945_p5 = pnand %p943_p4, %p940_p3 }
 0x32b   :  { %948 = shalt.err (!%p945_p5)
}
 0x32c   :  { %609 = dma.vmem_to_hbm [thread:$0]  %s607_s16, 128, %s1240_s11, [#allocation13]  }
 0x32d   :  { %s1016_s25 = smov [#allocation14]  }
 0x32e   :  { %s616_s27 = sshll.u32 %s1016_s25, 4  ;;  %s617_s27 = int_to_ptr.vmem [resolvable:$true] %s616_s27 }
 0x32f   :  { %s949_s28 = scalar_lea.vmem %s617_s27, 128  ;;  %p954_p7 = scmp.lt.s32.totalorder %s617_s27, %s617_s27 }
 0x330   :  { %p950_p6 = scmp.ne.s32.totalorder %s617_s27, %s949_s28  ;;  %p955_p8 = scmp.lt.s32.totalorder %s949_s28, %s949_s28 }
 0x332   :  { %p956_p9 = por %p955_p8, %p954_p7 }
 0x334   :  { %p957_p10 = pnand %p956_p9, %p950_p6 }
 0x336   :  { %960 = shalt.err (!%p957_p10)
}
 0x337   :  { %s961_s3 = scalar_lea.hbm %s1241_s12, 128 }
 0x338   :  { %p962_p11 = scmp.ne.s32.totalorder %s1241_s12, %s961_s3  ;;  %p965_p12 = scmp.lt.u32.totalorder %s961_s3, %s1241_s12 }
 0x33a   :  { %p967_p13 = pnand %p965_p12, %p962_p11 }
 0x33c   :  { %970 = shalt.err (!%p967_p13)
}
 0x33d   :  { %619 = dma.vmem_to_hbm [thread:$0]  %s617_s27, 128, %s1241_s12, [#allocation13]   ;;  %v666_v0 = vld [vmem:[%s1237_s8] ss:$0 sm:$0xff] }
 0x33e   :  { %s1017_s4 = smov [#allocation11]  }
 0x33f   :  { %s596_s9 = sshll.u32 %s1017_s4, 4  ;;  %s597_s9 = int_to_ptr.vmem [resolvable:$true] %s596_s9 }
 0x340   :  { %s971_s15 = scalar_lea.vmem %s597_s9, 128  ;;  %p976_p1 = scmp.lt.s32.totalorder %s597_s9, %s597_s9 }
 0x341   :  { %p972_p0 = scmp.ne.s32.totalorder %s597_s9, %s971_s15  ;;  %p977_p2 = scmp.lt.s32.totalorder %s971_s15, %s971_s15 }
 0x343   :  { %p978_p3 = por %p977_p2, %p976_p1 }
 0x345   :  { %p979_p4 = pnand %p978_p3, %p972_p0 }
 0x3f7   :  { %v577_v16 = vpop.f32.mrb[4].mxu1 }
 0x3f8   :  { %v578_v17 = vadd.f32 %v666_v0, %v577_v16  ;;  %v748_v18 = vpop.f32.mrb[5].mxu1 }
 0x3f9   :  { %v580_v19 = vpop.f32.mrb[6].mxu1 }
 0x3fa   :  { %v583_v20 = vmul.f32 0.5, %v578_v17  ;;  %v749_v21 = vpop.f32.mrb[7].mxu1 }
 0x3fc   :  { %815 = vtanh.f32 %v583_v20 }
 0x406   :  { %v816_v22 = vpop.eup %815 }
 0x407   :  { %v585_v23 = vmul.f32 0.5, %v816_v22 }
 0x409   :  { %v586_v24 = vadd.f32 0.5, %v585_v23 }
 0x40b   :  { %587 = vst [vmem:[#allocation11] sm:$0xff] %v586_v24 }
 0x40c   :  { %982 = shalt.err (!%p979_p4)
}
 0x40d   :  { %s983_s16 = scalar_lea.hbm %s1239_s10, 128 }
 0x40e   :  { %p984_p5 = scmp.ne.s32.totalorder %s1239_s10, %s983_s16  ;;  %p987_p6 = scmp.lt.u32.totalorder %s983_s16, %s1239_s10 }
 0x410   :  { %p989_p7 = pnand %p987_p6, %p984_p5 }
 0x412   :  { %992 = shalt.err (!%p989_p7)
}
 0x413   :  { %599 = dma.vmem_to_hbm [thread:$0]  %s597_s9, 128, %s1239_s10, [#allocation4]  }
 0x414   :  { %999 = dma.done.wait [#allocation4], 128  }
 0x415   :  { %1000 = vsyncadd [#allocation4], 4294967168 }
 0x416   :  { %1001 = dma.done.wait [#allocation13], 256  }
 0x417   :  { %1002 = vsyncadd [#allocation13], 4294967040 }
 0x418   :  { %629 = vsyncpa [#allocation3], 1 }
 0x419   :  { %630 = vsyncpa [#allocation6], 1 }
 0x41a   :  { %631 = vsyncpa [#allocation9], 1 }
 0x41b   :  { %632 = vsyncpa [#allocation4], 1 }
 0x41c   :  { %633 = vsyncpa [#allocation13], 1 }

</bundles_post_ra>
